<compile_context>
chip_gen: v7x
topology: tpu7x:2x2x1
jax: 0.10.0
libtpu: 0.0.40
codegen_flags: <defaults>
</compile_context>

<pallas_src>
import functools

import jax
import jax.numpy as jnp
from jax import lax
from jax.experimental import pallas as pl
from jax.experimental.pallas import tpu as pltpu


# ----------------------------- Pallas kernels ------------------------------ #

def _mm_bn_act_kernel(x_ref, w_ref, scale_ref, bias_ref, o_ref, *, relu):
    """(TM, K) @ (K, N) * scale + bias [+ ReLU].  bf16 MXU, f32 accumulate."""
    acc = jnp.dot(x_ref[...], w_ref[...], preferred_element_type=jnp.float32)
    y = acc * scale_ref[...] + bias_ref[...]
    if relu:
        y = jnp.maximum(y, 0.0)
    o_ref[...] = y.astype(o_ref.dtype)


def _conv3x3_bn_relu_kernel(src_ref, w_ref, scale_ref, bias_ref, o_ref, *,
                            taps, ho, wo):
    """3x3 conv as a 9-tap in-kernel reduction (no materialized im2col).

    src_ref : (1, R, S, C)     phase-decomposed padded input for one image
    w_ref   : (9, C, Cout)     tap-major 3x3 weights (kh-major, then kw)
    o_ref   : (1, ho*wo, Cout)
    `taps` is a static tuple of (row_offset, col_offset) per tap.
    """
    c_in = w_ref.shape[1]
    c_out = w_ref.shape[2]
    acc = jnp.zeros((ho * wo, c_out), jnp.float32)
    for t, (ro, co) in enumerate(taps):
        x_t = src_ref[0, ro:ro + ho, co:co + wo, :].reshape(ho * wo, c_in)
        acc = acc + jnp.dot(x_t, w_ref[t], preferred_element_type=jnp.float32)
    y = jnp.maximum(acc * scale_ref[...] + bias_ref[...], 0.0)
    o_ref[0] = y.astype(o_ref.dtype)


def _conv3_proj_residual_kernel(h2_ref, xs_ref, w3_ref, ws_ref,
                                s3_ref, b3_ref, ss_ref, bs_ref, o_ref):
    """relu((h2@w3)*s3+b3 + (xs@ws)*ss+bs): conv3 + projection shortcut fused."""
    main = jnp.dot(h2_ref[...], w3_ref[...], preferred_element_type=jnp.float32)
    main = main * s3_ref[...] + b3_ref[...]
    sc = jnp.dot(xs_ref[...], ws_ref[...], preferred_element_type=jnp.float32)
    sc = sc * ss_ref[...] + bs_ref[...]
    o_ref[...] = jnp.maximum(main + sc, 0.0).astype(o_ref.dtype)


def _conv3_id_residual_kernel(h2_ref, sc_ref, w3_ref, s3_ref, b3_ref, o_ref):
    """relu((h2@w3)*s3+b3 + shortcut): conv3 + identity shortcut fused."""
    main = jnp.dot(h2_ref[...], w3_ref[...], preferred_element_type=jnp.float32)
    main = main * s3_ref[...] + b3_ref[...]
    o_ref[...] = jnp.maximum(main + sc_ref[...].astype(jnp.float32), 0.0
                             ).astype(o_ref.dtype)


# ------------------------------ kernel wrappers ----------------------------- #

def _row_tile(m):
    """Pick a row tile: largest of {512,256,128} dividing m, preferring >=2
    grid steps (both v7x TensorCores busy); small m -> single padded block."""
    for t in (512, 256, 128):
        if m % t == 0 and m // t >= 2:
            return t
    for t in (512, 256, 128):
        if m % t == 0:
            return t
    if m < 128:
        return max(8, ((m + 7) // 8) * 8)
    return 128


def matmul_bn_act(x, w, scale, bias, *, relu, out_dtype):
    """(M, K) @ (K, N) * scale + bias, optional ReLU.  Tiled over M."""
    m, k = x.shape
    n = w.shape[1]
    tm = _row_tile(m)
    mp = pl.cdiv(m, tm) * tm
    if mp != m:
        x = jnp.pad(x, ((0, mp - m), (0, 0)))
    out = pl.pallas_call(
        functools.partial(_mm_bn_act_kernel, relu=relu),
        out_shape=jax.ShapeDtypeStruct((mp, n), out_dtype),
        grid=(mp // tm,),
        in_specs=[
            pl.BlockSpec((tm, k), lambda i: (i, 0)),
            pl.BlockSpec((k, n), lambda i: (0, 0)),
            pl.BlockSpec((1, n), lambda i: (0, 0)),
            pl.BlockSpec((1, n), lambda i: (0, 0)),
        ],
        out_specs=pl.BlockSpec((tm, n), lambda i: (i, 0)),
        compiler_params=pltpu.CompilerParams(dimension_semantics=("parallel",)),
    )(x, w, scale, bias)
    return out if mp == m else out[:m]


def conv3x3_bn_relu(src, w2, scale, bias, *, ho, wo, taps, out_dtype):
    """Fused 3x3 conv + BN + ReLU.  Grid over images; 9 taps reduced in-kernel."""
    n, r, s1, c = src.shape
    c_out = w2.shape[-1]
    return pl.pallas_call(
        functools.partial(_conv3x3_bn_relu_kernel, taps=taps, ho=ho, wo=wo),
        out_shape=jax.ShapeDtypeStruct((n, ho * wo, c_out), out_dtype),
        grid=(n,),
        in_specs=[
            pl.BlockSpec((1, r, s1, c), lambda i: (i, 0, 0, 0)),
            pl.BlockSpec((9, c, c_out), lambda i: (0, 0, 0)),
            pl.BlockSpec((1, c_out), lambda i: (0, 0)),
            pl.BlockSpec((1, c_out), lambda i: (0, 0)),
        ],
        out_specs=pl.BlockSpec((1, ho * wo, c_out), lambda i: (i, 0, 0)),
        compiler_params=pltpu.CompilerParams(dimension_semantics=("parallel",)),
    )(src, w2, scale, bias)


def conv3_residual(h2, shortcut_in, w3, s3, b3, ws=None, ss=None, bs=None, *,
                   out_dtype=jnp.float32):
    """Fused conv3 (1x1) + BN + shortcut (+BN) + add + ReLU, tiled over M."""
    m, k = h2.shape
    n = w3.shape[1]
    tm = _row_tile(m)
    mp = pl.cdiv(m, tm) * tm
    if mp != m:
        h2 = jnp.pad(h2, ((0, mp - m), (0, 0)))
        shortcut_in = jnp.pad(shortcut_in, ((0, mp - m), (0, 0)))
    ks = shortcut_in.shape[1]

    def row_spec(cols):
        return pl.BlockSpec((tm, cols), lambda i: (i, 0))

    def full_spec(rows, cols):
        return pl.BlockSpec((rows, cols), lambda i: (0, 0))

    if ws is not None:
        out = pl.pallas_call(
            _conv3_proj_residual_kernel,
            out_shape=jax.ShapeDtypeStruct((mp, n), out_dtype),
            grid=(mp // tm,),
            in_specs=[
                row_spec(k), row_spec(ks),
                full_spec(k, n), full_spec(ks, n),
                full_spec(1, n), full_spec(1, n),
                full_spec(1, n), full_spec(1, n),
            ],
            out_specs=row_spec(n),
            compiler_params=pltpu.CompilerParams(
                dimension_semantics=("parallel",)),
        )(h2, shortcut_in, w3, ws, s3, b3, ss, bs)
    else:
        out = pl.pallas_call(
            _conv3_id_residual_kernel,
            out_shape=jax.ShapeDtypeStruct((mp, n), out_dtype),
            grid=(mp // tm,),
            in_specs=[
                row_spec(k), row_spec(n),
                full_spec(k, n),
                full_spec(1, n), full_spec(1, n),
            ],
            out_specs=row_spec(n),
            compiler_params=pltpu.CompilerParams(
                dimension_semantics=("parallel",)),
        )(h2, shortcut_in, w3, s3, b3)
    return out if mp == m else out[:m]


# --------------------------------- glue ------------------------------------ #

def _fold_bn(gamma, beta, running_mean, running_var, eps=1e-5):
    scale = gamma / jnp.sqrt(running_var + eps)
    bias = beta - running_mean * scale
    return scale, bias


def _build_tap_source(h1, stride, ho, wo):
    """Phase-decompose padded h1 so every 3x3 tap is a contiguous 2-D window.

    Returns src of shape (N, R, S, C) (for stride=1, R=H+2; for stride=s the
    s*s phase slabs are stacked along R) and a static tuple of
    (row_offset, col_offset) per tap (kh-major, kw-minor).
    Total extra HBM traffic ~1x h1 (vs ~9x for a materialized im2col tensor).
    """
    s = stride
    hp = jnp.pad(h1, ((0, 0), (1, 1), (1, 1), (0, 0)))
    rows = ho + 2 // s
    cols = wo + 2 // s
    slabs = []
    for p in range(s):
        for q in range(s):
            sl = hp[:, p::s, q::s, :][:, :rows, :cols, :]
            pr, pc = rows - sl.shape[1], cols - sl.shape[2]
            if pr or pc:
                sl = jnp.pad(sl, ((0, 0), (0, pr), (0, pc), (0, 0)))
            slabs.append(sl)
    src = slabs[0] if s == 1 else jnp.concatenate(slabs, axis=1)
    taps = tuple(
        (((kh % s) * s + (kw % s)) * rows + kh // s, kw // s)
        for kh in range(3) for kw in range(3))
    return src, taps


class BottleNeckPallas:
    expansion = 4

    def __init__(self, in_channels, out_channels, stride=1, key=None):
        self.in_channels = in_channels
        self.out_channels = out_channels
        self.stride = stride
        exp_ch = out_channels * self.expansion
        self.exp_channels = exp_ch
        self.has_shortcut = (stride != 1) or (in_channels != exp_ch)

        if key is None:
            key = jax.random.PRNGKey(0)
        k1, k2, k3, k4 = jax.random.split(key, 4)

        def winit(k, shape):
            fan_in = 1
            for d in shape[:-1]:
                fan_in *= d
            w = jax.random.normal(k, shape, jnp.float32)
            return w * (1.0 / jnp.sqrt(jnp.float32(fan_in)))

        # Weights stored matmul-ready and in bf16 (MXU-native):
        #   1x1 conv: (Cin, Cout); 3x3 conv: (3,3,Cin,Cout) -> (9, Cin, Cout).
        self.w1 = winit(k1, (in_channels, out_channels)).astype(jnp.bfloat16)
        self.w2 = winit(k2, (3, 3, out_channels, out_channels)).reshape(
            9, out_channels, out_channels).astype(jnp.bfloat16)
        self.w3 = winit(k3, (out_channels, exp_ch)).astype(jnp.bfloat16)
        if self.has_shortcut:
            self.ws = winit(k4, (in_channels, exp_ch)).astype(jnp.bfloat16)

        # Folded inference-mode BatchNorm (PyTorch defaults: gamma=1, beta=0,
        # running_mean=0, running_var=1).
        def bn(c_):
            sc, bi = _fold_bn(jnp.ones((c_,), jnp.float32),
                              jnp.zeros((c_,), jnp.float32),
                              jnp.zeros((c_,), jnp.float32),
                              jnp.ones((c_,), jnp.float32))
            return sc.reshape(1, c_), bi.reshape(1, c_)

        self.bn1_s, self.bn1_b = bn(out_channels)
        self.bn2_s, self.bn2_b = bn(out_channels)
        self.bn3_s, self.bn3_b = bn(exp_ch)
        if self.has_shortcut:
            self.bns_s, self.bns_b = bn(exp_ch)

    def __call__(self, x_nchw):
        n, cin, h, w = x_nchw.shape
        assert cin == self.in_channels
        cmid, exp_ch, s = self.out_channels, self.exp_channels, self.stride
        ho = (h + 2 - 3) // s + 1
        wo = (w + 2 - 3) // s + 1

        # TODO(synk): boundary NCHW<->NHWC transposes remain; chained NHWC
        #             blocks would elide them.
        x_f32 = jnp.transpose(x_nchw, (0, 2, 3, 1))            # NHWC
        x = x_f32.astype(jnp.bfloat16)

        # --- conv1 (1x1) + BN + ReLU ---
        h1 = matmul_bn_act(x.reshape(n * h * w, cin), self.w1,
                           self.bn1_s, self.bn1_b,
                           relu=True, out_dtype=jnp.bfloat16)
        h1 = h1.reshape(n, h, w, cmid)

        # --- conv2 (3x3, stride, pad=1) + BN + ReLU: 9-tap in-kernel sum ---
        src, taps = _build_tap_source(h1, s, ho, wo)
        h2 = conv3x3_bn_relu(src, self.w2, self.bn2_s, self.bn2_b,
                             ho=ho, wo=wo, taps=taps, out_dtype=jnp.bfloat16)
        h2 = h2.reshape(n * ho * wo, cmid)

        # --- conv3 (1x1) + BN + shortcut + add + ReLU, fused in one kernel ---
        if self.has_shortcut:
            xs = x[:, ::s, ::s, :][:, :ho, :wo, :].reshape(n * ho * wo, cin)
            out = conv3_residual(h2, xs, self.w3, self.bn3_s, self.bn3_b,
                                 self.ws, self.bns_s, self.bns_b,
                                 out_dtype=jnp.float32)
        else:
            sc = x_f32.reshape(n * ho * wo, exp_ch)
            out = conv3_residual(h2, sc, self.w3, self.bn3_s, self.bn3_b,
                                 out_dtype=jnp.float32)

        out = out.reshape(n, ho, wo, exp_ch)
        return jnp.transpose(out, (0, 3, 1, 2))                # NCHW


def _reference_forward(block, x_nchw):
    """Pure-JAX (XLA) f32 reference of the same folded-BN forward."""
    s = block.stride
    x = jnp.transpose(x_nchw, (0, 2, 3, 1)).astype(jnp.float32)
    n, h, w, _ = x.shape
    cmid = block.out_channels
    ho = (h + 2 - 3) // s + 1
    wo = (w + 2 - 3) // s + 1

    w1 = block.w1.astype(jnp.float32)
    w2 = block.w2.astype(jnp.float32).reshape(3, 3, cmid, cmid)
    w3 = block.w3.astype(jnp.float32)

    h1 = jnp.maximum(jnp.einsum('nhwc,cd->nhwd', x, w1)
                     * block.bn1_s[0] + block.bn1_b[0], 0.0)
    h2 = lax.conv_general_dilated(
        h1, w2, window_strides=(s, s), padding=((1, 1), (1, 1)),
        dimension_numbers=('NHWC', 'HWIO', 'NHWC'))
    h2 = jnp.maximum(h2 * block.bn2_s[0] + block.bn2_b[0], 0.0)
    h3 = jnp.einsum('nhwc,cd->nhwd', h2, w3) * block.bn3_s[0] + block.bn3_b[0]

    if block.has_shortcut:
        ws = block.ws.astype(jnp.float32)
        xs = x[:, ::s, ::s, :][:, :ho, :wo, :]
        sc = (jnp.einsum('nhwc,cd->nhwd', xs, ws)
              * block.bns_s[0] + block.bns_b[0])
    else:
        sc = x
    out = jnp.maximum(h3 + sc, 0.0)
    return jnp.transpose(out, (0, 3, 1, 2))


if __name__ == "__main__":
    key = jax.random.PRNGKey(0)
    kx, kp = jax.random.split(key)

    # small shapes: batch=2, in_channels=4, spatial=16x16, out_channels=8, stride=2
    n, cin, h, w = 2, 4, 16, 16
    out_channels, stride = 8, 2
    x = jax.random.normal(kx, (n, cin, h, w), jnp.float32)

    block = BottleNeckPallas(cin, out_channels, stride=stride, key=kp)
    y = jax.block_until_ready(block(x))

    expected_shape = (n, out_channels * BottleNeckPallas.expansion,
                      h // stride, w // stride)
    assert y.shape == expected_shape, (y.shape, expected_shape)
    assert bool(jnp.all(y >= 0.0))            # final ReLU
    assert bool(jnp.all(jnp.isfinite(y)))

    # correctness vs pure-JAX f32 reference (bf16 MXU inputs -> loose tolerance)
    y_ref = jax.block_until_ready(_reference_forward(block, x))
    max_err = float(jnp.max(jnp.abs(y - y_ref)))
    assert bool(jnp.allclose(y, y_ref, atol=1e-1, rtol=1e-1)), max_err

    print("KERNEL_OK")
</pallas_src>

<mosaic_0001>
module attributes {stable_mosaic.version = 11 : i64} {
  func.func @_mm_bn_act_kernel(%arg0: i32, %arg1: memref<256x4xbf16, #tpu.memory_space<vmem>>, %arg2: memref<4x8xbf16, #tpu.memory_space<vmem>>, %arg3: memref<1x8xf32, #tpu.memory_space<vmem>>, %arg4: memref<1x8xf32, #tpu.memory_space<vmem>>, %arg5: memref<256x8xbf16, #tpu.memory_space<vmem>>) attributes {dimension_semantics = [#tpu.dimension_semantics<parallel>], iteration_bounds = array<i64: 2>, scalar_prefetch = 0 : i64, scratch_operands = 0 : i64, tpu.core_type = #tpu.core_type<tc>, window_params = [{transform_indices = @transform_0, window_bounds = array<i64: 256, 4>}, {pipeline_mode = #tpu.pipeline_mode<synchronous>, transform_indices = @transform_1, window_bounds = array<i64: 4, 8>}, {pipeline_mode = #tpu.pipeline_mode<synchronous>, transform_indices = @transform_2, window_bounds = array<i64: 1, 8>}, {pipeline_mode = #tpu.pipeline_mode<synchronous>, transform_indices = @transform_3, window_bounds = array<i64: 1, 8>}, {transform_indices = @transform_4, window_bounds = array<i64: 256, 8>}]} {
    %c0 = arith.constant 0 : index
    %c0_0 = arith.constant 0 : index
    %0 = vector.load %arg1[%c0, %c0_0] : memref<256x4xbf16, #tpu.memory_space<vmem>>, vector<256x4xbf16>
    %c0_1 = arith.constant 0 : index
    %c0_2 = arith.constant 0 : index
    %1 = vector.load %arg2[%c0_1, %c0_2] : memref<4x8xbf16, #tpu.memory_space<vmem>>, vector<4x8xbf16>
    %cst = arith.constant dense<0.000000e+00> : vector<256x8xf32>
    %2 = tpu.matmul %0, %1, %cst {dimension_numbers = #tpu.dot_dimension_numbers<[1], [0], [0], [1], [0, 0, 1, 1], [], []>} : vector<256x4xbf16>, vector<4x8xbf16>, vector<256x8xf32> -> vector<256x8xf32>
    %c0_3 = arith.constant 0 : index
    %c0_4 = arith.constant 0 : index
    %3 = vector.load %arg3[%c0_3, %c0_4] : memref<1x8xf32, #tpu.memory_space<vmem>>, vector<1x8xf32>
    %4 = vector.broadcast %3 : vector<1x8xf32> to vector<256x8xf32>
    %5 = arith.mulf %2, %4 : vector<256x8xf32>
    %c0_5 = arith.constant 0 : index
    %c0_6 = arith.constant 0 : index
    %6 = vector.load %arg4[%c0_5, %c0_6] : memref<1x8xf32, #tpu.memory_space<vmem>>, vector<1x8xf32>
    %7 = vector.broadcast %6 : vector<1x8xf32> to vector<256x8xf32>
    %8 = arith.addf %5, %7 : vector<256x8xf32>
    %cst_7 = arith.constant 0.000000e+00 : f32
    %9 = vector.broadcast %cst_7 : f32 to vector<256x8xf32>
    %10 = arith.maximumf %8, %9 : vector<256x8xf32>
    %11 = arith.truncf %10 : vector<256x8xf32> to vector<256x8xbf16>
    %c0_8 = arith.constant 0 : index
    %c0_9 = arith.constant 0 : index
    %12 = vector.load %arg5[%c0_8, %c0_9] : memref<256x8xbf16, #tpu.memory_space<vmem>>, vector<256x8xbf16>
    tpu.vector_store %arg5[%c0_8, %c0_9], %11 {strides = array<i32>} : memref<256x8xbf16, #tpu.memory_space<vmem>>, vector<256x8xbf16>,
    return
  }
  func.func @transform_0(%arg0: i32) -> (i32, i32) {
    %c0_i32 = arith.constant 0 : i32
    %c0_i32_0 = arith.constant 0 : i32
    return %arg0, %c0_i32 : i32, i32
  }
  func.func @transform_1(%arg0: i32) -> (i32, i32) {
    %c0_i32 = arith.constant 0 : i32
    %c0_i32_0 = arith.constant 0 : i32
    %c0_i32_1 = arith.constant 0 : i32
    return %c0_i32, %c0_i32_0 : i32, i32
  }
  func.func @transform_2(%arg0: i32) -> (i32, i32) {
    %c0_i32 = arith.constant 0 : i32
    %c0_i32_0 = arith.constant 0 : i32
    %c0_i32_1 = arith.constant 0 : i32
    return %c0_i32, %c0_i32_0 : i32, i32
  }
  func.func @transform_3(%arg0: i32) -> (i32, i32) {
    %c0_i32 = arith.constant 0 : i32
    %c0_i32_0 = arith.constant 0 : i32
    %c0_i32_1 = arith.constant 0 : i32
    return %c0_i32, %c0_i32_0 : i32, i32
  }
  func.func @transform_4(%arg0: i32) -> (i32, i32) {
    %c0_i32 = arith.constant 0 : i32
    %c0_i32_0 = arith.constant 0 : i32
    return %arg0, %c0_i32 : i32, i32
  }
}

</mosaic_0001>

<bundles_post_ra>
// kernel: tpu_custom_call.1
= control target key start
LH: loop header
LB: loop body
LE: loop exit
PB: predicated region body
PF: predicated region fallthrough
CT: control target
= control target key end

     0   :  { %s1077_s15 = smov 0   ;;  %s1278_s0 = inlined_call_operand.vmem [shape: bf16[512,4], index: 0, kind: input, shape index: {}]   ;;  %s1279_s1 = inlined_call_operand.vmem [shape: bf16[4,8], index: 1, kind: input, shape index: {}]   ;;  %s1280_s2 = inlined_call_operand.vmem [shape: f32[1,8], index: 2, kind: input, shape index: {}]   ;;  %s1281_s3 = inlined_call_operand.vmem [shape: f32[1,8], index: 3, kind: input, shape index: {}]   ;;  %s1282_s4 = inlined_call_operand.vmem [shape: bf16[512,8], index: 4, kind: output, shape index: {}]  }
   0x1 LB: > { %s856_s16 = sadd.s32 4294967295, %s1050_s15   ;;  %p860_p0 = scmp.ge.s32.totalorder %s1050_s15, 1  ;;  %s1050_s15 = sphi %s1077_s15, %s14_s15  }
   0x2   : > { %p163_p1 = scmp.lt.s32.totalorder %s1050_s15, 3 }
   0x4   : > { %p164_p2 = pnand %p860_p0, %p163_p1 }
   0x5   : > { %v234_v0 = vld [vmem:[%s1279_s1] sm:$0x3] (!%p164_p2)  ;;  %vm364_vm0 = vcmask (!%p164_p2), 1041408   ;;  %s861_s19 = sshll.u32 (!%p164_p2), %s856_s16, 5  ;;  %vm315_vm1 = vcmask (!%p164_p2), 31744   ;;  %vm767_vm2 = vcmask (!%p164_p2), 60416  }
   0x6   : > { %167 = sbr.rel (%p164_p2) target bundleno = 269 (0x10d), region = 36  ;;  %1018 = vmatprep.subr.msk.bf16.mxu0 (!%p164_p2), %vm364_vm0, %v234_v0  ;;  %1019 = vmatprep.subr.msk.bf16.mxu1 (!%p164_p2), %vm364_vm0, %v234_v0  ;;  %v366_v1 = vsel (!%p164_p2), %vm364_vm0, %v234_v0, 0  ;;  %p190_p3 = scmp.lt.s32.totalorder (!%p164_p2), %s861_s19, 63  ;;  %v1133_v18 = vld [vmem:[%s1280_s2] ss:$0 sm:$0xff] (!%p164_p2) }
   0x7   : > { %983 = vmatpush3.bf16.msra.mxu0 (!%p164_p2), %v366_v1  ;;  %1017 = vmatpush3.bf16.msra.mxu1 (!%p164_p2), %v366_v1  ;;  %v1138_v20 = vld [vmem:[%s1281_s3] ss:$0 sm:$0xff] (!%p164_p2) }
   0xd   : > { %s1284_s19 = smov (!%p190_p3, %s861_s19), 63 }
   0xe   : > { %s862_s20 = sshll.u32 %s1284_s19, 2 }
   0xf   : > { %s1096_s23 = scalar_lea.vmem %s1278_s0, %s862_s20  ;;  %s1158_s30 = scalar_lea.vmem %s1282_s4, %s862_s20 }
  0x10   : > { %v1028_v2 = vld [vmem:[%s1096_s23] sm:$0xff]   ;;  %v1030_v4 = vld [vmem:[%s1096_s23 + $0x8] sm:$0xff]   ;;  %v1032_v6 = vld [vmem:[%s1096_s23 + $0x10] sm:$0xff]  }
  0x11   : > { %v1029_v3 = vld [vmem:[%s1096_s23 + $0x40] sm:$0xff]   ;;  %984 = vmatprep.mubr.msk.bf16.mxu0 %vm315_vm1, %v1028_v2  ;;  %v1031_v5 = vld [vmem:[%s1096_s23 + $0x48] sm:$0xff]   ;;  %v1033_v7 = vld [vmem:[%s1096_s23 + $0x50] sm:$0xff]  }
  0x12   : > { %1000 = vmatprep.mubr.msk.bf16.mxu1 %vm315_vm1, %v1029_v3  ;;  %985 = vmatmul.mubr.msk.bf16.vlgmr.msra.gmra.mrb[0].mxu0 %vm315_vm1, %v1030_v4  ;;  %v1034_v8 = vld [vmem:[%s1096_s23 + $0x18] sm:$0xff]   ;;  %v1036_v10 = vld [vmem:[%s1096_s23 + $0x20] sm:$0xff]   ;;  %v1038_v12 = vld [vmem:[%s1096_s23 + $0x28] sm:$0xff]  }
  0x13   : > { %1001 = vmatmul.mubr.msk.bf16.vlgmr.msra.gmra.mrb[0].mxu1 %vm315_vm1, %v1031_v5  ;;  %988 = vmatprep.mubr.msk.bf16.mxu0 %vm315_vm1, %v1032_v6  ;;  %v1035_v9 = vld [vmem:[%s1096_s23 + $0x58] sm:$0xff]   ;;  %v1037_v11 = vld [vmem:[%s1096_s23 + $0x60] sm:$0xff]   ;;  %v1039_v13 = vld [vmem:[%s1096_s23 + $0x68] sm:$0xff]  }
  0x14   : > { %1004 = vmatprep.mubr.msk.bf16.mxu1 %vm315_vm1, %v1033_v7  ;;  %v1040_v14 = vld [vmem:[%s1096_s23 + $0x30] sm:$0xff]   ;;  %v1042_v16 = vld [vmem:[%s1096_s23 + $0x38] sm:$0xff]  }
  0x15   : > { %v1041_v15 = vld [vmem:[%s1096_s23 + $0x70] sm:$0xff]   ;;  %v1043_v17 = vld [vmem:[%s1096_s23 + $0x78] sm:$0xff]  }
  0x1a   : > { %989 = vmatmul.mubr.msk.bf16.gmra.mrb[4].mxu0 %vm315_vm1, %v1034_v8 }
  0x1b   : > { %1005 = vmatmul.mubr.msk.bf16.gmra.mrb[4].mxu1 %vm315_vm1, %v1035_v9  ;;  %992 = vmatprep.mubr.msk.bf16.mxu0 %vm315_vm1, %v1036_v10 }
  0x1c   : > { %1008 = vmatprep.mubr.msk.bf16.mxu1 %vm315_vm1, %v1037_v11 }
  0x22   : > { %993 = vmatmul.mubr.msk.bf16.gmra.mrb[8].mxu0 %vm315_vm1, %v1038_v12 }
  0x23   : > { %1009 = vmatmul.mubr.msk.bf16.gmra.mrb[8].mxu1 %vm315_vm1, %v1039_v13  ;;  %996 = vmatprep.mubr.msk.bf16.mxu0 %vm315_vm1, %v1040_v14 }
  0x24   : > { %1012 = vmatprep.mubr.msk.bf16.mxu1 %vm315_vm1, %v1041_v15 }
  0x2a   : > { %997 = vmatmul.mubr.msk.bf16.gmra.mrb[12].mxu0 %vm315_vm1, %v1042_v16 }
  0x2b   : > { %1013 = vmatmul.mubr.msk.bf16.gmra.mrb[12].mxu1 %vm315_vm1, %v1043_v17 }
  0xe5   : > { %v986_v19 = vpop.f32.mrb[0].mxu0 }
  0xe6   : > { %v538_v21 = vmul.f32 %v986_v19, %v1133_v18  ;;  %v1002_v22 = vpop.f32.mrb[0].mxu1  ;;  %v402_v23 = vpop.f32.mrb[1].mxu0 }
  0xe7   : > { %v554_v24 = vmul.f32 %v1002_v22, %v1133_v18  ;;  %v536_v25 = vmul.f32 %v1133_v18, %v402_v23  ;;  %v466_v26 = vpop.f32.mrb[1].mxu1  ;;  %v987_v27 = vpop.f32.mrb[2].mxu0 }
  0xe8   : > { %v577_v28 = vadd.f32 %v1138_v20, %v538_v21  ;;  %v552_v29 = vmul.f32 %v1133_v18, %v466_v26  ;;  %v539_v30 = vmul.f32 %v987_v27, %v1133_v18  ;;  %v1003_v31 = vpop.f32.mrb[2].mxu1  ;;  %v405_v32 = vpop.f32.mrb[3].mxu0 }
  0xe9   : > { %v593_v33 = vadd.f32 %v1138_v20, %v554_v24  ;;  %v575_v34 = vadd.f32 %v1138_v20, %v536_v25  ;;  %v555_v35 = vmul.f32 %v1003_v31, %v1133_v18  ;;  %v537_v36 = vmul.f32 %v1133_v18, %v405_v32  ;;  %v469_v37 = vpop.f32.mrb[3].mxu1 }
  0xea   : > { %v609_v38 = vmax.f32 %v577_v28, 0.0  ;;  %v591_v39 = vadd.f32 %v1138_v20, %v552_v29  ;;  %v578_v40 = vadd.f32 %v1138_v20, %v539_v30  ;;  %v553_v41 = vmul.f32 %v1133_v18, %v469_v37 }
  0xeb   : > { %v625_v42 = vmax.f32 %v593_v33, 0.0  ;;  %v607_v43 = vmax.f32 %v575_v34, 0.0  ;;  %v594_v44 = vadd.f32 %v1138_v20, %v555_v35  ;;  %v576_v45 = vadd.f32 %v1138_v20, %v537_v36 }
  0xec   : > { %v935_v46 = vpack.c.bf16 %v609_v38, %v609_v38  ;;  %v623_v47 = vmax.f32 %v591_v39, 0.0  ;;  %v610_v48 = vmax.f32 %v578_v40, 0.0  ;;  %v592_v49 = vadd.f32 %v1138_v20, %v553_v41 }
  0xed   : > { %v951_v50 = vpack.c.bf16 %v625_v42, %v625_v42  ;;  %v933_v51 = vpack.c.bf16 %v607_v43, %v607_v43  ;;  %v626_v52 = vmax.f32 %v594_v44, 0.0  ;;  %v608_v53 = vmax.f32 %v576_v45, 0.0  ;;  %v990_v54 = vpop.f32.mrb[4].mxu0 }
  0xee   : > { %770 = vst.msk [vmem:[%s1158_s30 + $0x8] sm:$0xf] %vm767_vm2, %v935_v46  ;;  %v949_v55 = vpack.c.bf16 %v623_v47, %v623_v47  ;;  %v936_v56 = vpack.c.bf16 %v610_v48, %v610_v48  ;;  %v624_v57 = vmax.f32 %v592_v49, 0.0  ;;  %v542_v58 = vmul.f32 %v990_v54, %v1133_v18  ;;  %v1006_v59 = vpop.f32.mrb[4].mxu1  ;;  %v418_v60 = vpop.f32.mrb[5].mxu0 }
  0xef   : > { %786 = vst.msk [vmem:[%s1158_s30 + $0x48] sm:$0xf] %vm767_vm2, %v951_v50  ;;  %768 = vst.msk [vmem:[%s1158_s30] sm:$0xf] %vm767_vm2, %v933_v51  ;;  %v952_v61 = vpack.c.bf16 %v626_v52, %v626_v52  ;;  %v934_v62 = vpack.c.bf16 %v608_v53, %v608_v53  ;;  %v558_v63 = vmul.f32 %v1006_v59, %v1133_v18  ;;  %v482_v1 = vpop.f32.mrb[5].mxu1  ;;  %v991_v2 = vpop.f32.mrb[6].mxu0 }
  0xf0   : > { %v540_v0 = vmul.f32 %v1133_v18, %v418_v60  ;;  %784 = vst.msk [vmem:[%s1158_s30 + $0x40] sm:$0xf] %vm767_vm2, %v949_v55  ;;  %771 = vst.msk [vmem:[%s1158_s30 + $0xc] sm:$0xf] %vm767_vm2, %v936_v56  ;;  %v950_v3 = vpack.c.bf16 %v624_v57, %v624_v57  ;;  %v581_v4 = vadd.f32 %v1138_v20, %v542_v58  ;;  %v1007_v7 = vpop.f32.mrb[6].mxu1  ;;  %v421_v8 = vpop.f32.mrb[7].mxu0 }
  0xf1   : > { %v556_v5 = vmul.f32 %v1133_v18, %v482_v1  ;;  %v543_v6 = vmul.f32 %v991_v2, %v1133_v18  ;;  %787 = vst.msk [vmem:[%s1158_s30 + $0x4c] sm:$0xf] %vm767_vm2, %v952_v61  ;;  %769 = vst.msk [vmem:[%s1158_s30 + $0x4] sm:$0xf] %vm767_vm2, %v934_v62  ;;  %v597_v9 = vadd.f32 %v1138_v20, %v558_v63  ;;  %v485_v13 = vpop.f32.mrb[7].mxu1 }
  0xf2   : > { %v579_v10 = vadd.f32 %v1138_v20, %v540_v0  ;;  %v559_v11 = vmul.f32 %v1007_v7, %v1133_v18  ;;  %v541_v12 = vmul.f32 %v1133_v18, %v421_v8  ;;  %785 = vst.msk [vmem:[%s1158_s30 + $0x44] sm:$0xf] %vm767_vm2, %v950_v3  ;;  %v613_v14 = vmax.f32 %v581_v4, 0.0 }
  0xf3   : > { %v595_v15 = vadd.f32 %v1138_v20, %v556_v5  ;;  %v582_v16 = vadd.f32 %v1138_v20, %v543_v6  ;;  %v557_v17 = vmul.f32 %v1133_v18, %v485_v13  ;;  %v629_v19 = vmax.f32 %v597_v9, 0.0 }
  0xf4   : > { %v611_v21 = vmax.f32 %v579_v10, 0.0  ;;  %v598_v22 = vadd.f32 %v1138_v20, %v559_v11  ;;  %v580_v23 = vadd.f32 %v1138_v20, %v541_v12  ;;  %v939_v24 = vpack.c.bf16 %v613_v14, %v613_v14 }
  0xf5   : > { %v627_v25 = vmax.f32 %v595_v15, 0.0  ;;  %v614_v26 = vmax.f32 %v582_v16, 0.0  ;;  %v596_v27 = vadd.f32 %v1138_v20, %v557_v17  ;;  %v955_v28 = vpack.c.bf16 %v629_v19, %v629_v19  ;;  %v994_v32 = vpop.f32.mrb[8].mxu0 }
  0xf6   : > { %v937_v29 = vpack.c.bf16 %v611_v21, %v611_v21  ;;  %v630_v30 = vmax.f32 %v598_v22, 0.0  ;;  %v612_v31 = vmax.f32 %v580_v23, 0.0  ;;  %774 = vst.msk [vmem:[%s1158_s30 + $0x18] sm:$0xf] %vm767_vm2, %v939_v24  ;;  %v546_v36 = vmul.f32 %v994_v32, %v1133_v18  ;;  %v1010_v37 = vpop.f32.mrb[8].mxu1  ;;  %v434_v38 = vpop.f32.mrb[9].mxu0 }
  0xf7   : > { %v953_v33 = vpack.c.bf16 %v627_v25, %v627_v25  ;;  %v940_v34 = vpack.c.bf16 %v614_v26, %v614_v26  ;;  %v628_v35 = vmax.f32 %v596_v27, 0.0  ;;  %790 = vst.msk [vmem:[%s1158_s30 + $0x58] sm:$0xf] %vm767_vm2, %v955_v28  ;;  %v562_v41 = vmul.f32 %v1010_v37, %v1133_v18  ;;  %v498_v43 = vpop.f32.mrb[9].mxu1  ;;  %v995_v44 = vpop.f32.mrb[10].mxu0 }
  0xf8   : > { %772 = vst.msk [vmem:[%s1158_s30 + $0x10] sm:$0xf] %vm767_vm2, %v937_v29  ;;  %v956_v39 = vpack.c.bf16 %v630_v30, %v630_v30  ;;  %v938_v40 = vpack.c.bf16 %v612_v31, %v612_v31  ;;  %v544_v42 = vmul.f32 %v1133_v18, %v434_v38  ;;  %v585_v46 = vadd.f32 %v1138_v20, %v546_v36  ;;  %v1011_v49 = vpop.f32.mrb[10].mxu1  ;;  %v437_v50 = vpop.f32.mrb[11].mxu0 }
  0xf9   : > { %788 = vst.msk [vmem:[%s1158_s30 + $0x50] sm:$0xf] %vm767_vm2, %v953_v33  ;;  %775 = vst.msk [vmem:[%s1158_s30 + $0x1c] sm:$0xf] %vm767_vm2, %v940_v34  ;;  %v954_v45 = vpack.c.bf16 %v628_v35, %v628_v35  ;;  %v560_v47 = vmul.f32 %v1133_v18, %v498_v43  ;;  %v547_v48 = vmul.f32 %v995_v44, %v1133_v18  ;;  %v501_v55 = vpop.f32.mrb[11].mxu1 }
  0xfa   : > { %791 = vst.msk [vmem:[%s1158_s30 + $0x5c] sm:$0xf] %vm767_vm2, %v956_v39  ;;  %773 = vst.msk [vmem:[%s1158_s30 + $0x14] sm:$0xf] %vm767_vm2, %v938_v40  ;;  %v601_v51 = vadd.f32 %v1138_v20, %v562_v41  ;;  %v583_v52 = vadd.f32 %v1138_v20, %v544_v42  ;;  %v563_v53 = vmul.f32 %v1011_v49, %v1133_v18  ;;  %v617_v56 = vmax.f32 %v585_v46, 0.0 }
  0xfb   : > { %v545_v54 = vmul.f32 %v1133_v18, %v437_v50  ;;  %789 = vst.msk [vmem:[%s1158_s30 + $0x54] sm:$0xf] %vm767_vm2, %v954_v45  ;;  %v599_v57 = vadd.f32 %v1138_v20, %v560_v47  ;;  %v586_v58 = vadd.f32 %v1138_v20, %v547_v48  ;;  %v561_v59 = vmul.f32 %v1133_v18, %v501_v55 }
  0xfc   : > { %v633_v60 = vmax.f32 %v601_v51, 0.0  ;;  %v615_v61 = vmax.f32 %v583_v52, 0.0  ;;  %v602_v62 = vadd.f32 %v1138_v20, %v563_v53  ;;  %v943_v0 = vpack.c.bf16 %v617_v56, %v617_v56 }
  0xfd   : > { %v584_v63 = vadd.f32 %v1138_v20, %v545_v54  ;;  %v631_v1 = vmax.f32 %v599_v57, 0.0  ;;  %v618_v2 = vmax.f32 %v586_v58, 0.0  ;;  %v600_v3 = vadd.f32 %v1138_v20, %v561_v59  ;;  %v998_v8 = vpop.f32.mrb[12].mxu0 }
  0xfe   : > { %v959_v4 = vpack.c.bf16 %v633_v60, %v633_v60  ;;  %v941_v5 = vpack.c.bf16 %v615_v61, %v615_v61  ;;  %v634_v6 = vmax.f32 %v602_v62, 0.0  ;;  %778 = vst.msk [vmem:[%s1158_s30 + $0x28] sm:$0xf] %vm767_vm2, %v943_v0  ;;  %v550_v12 = vmul.f32 %v998_v8, %v1133_v18  ;;  %v1014_v13 = vpop.f32.mrb[12].mxu1  ;;  %v450_v14 = vpop.f32.mrb[13].mxu0 }
  0xff   : > { %v616_v7 = vmax.f32 %v584_v63, 0.0  ;;  %v957_v9 = vpack.c.bf16 %v631_v1, %v631_v1  ;;  %v944_v10 = vpack.c.bf16 %v618_v2, %v618_v2  ;;  %v632_v11 = vmax.f32 %v600_v3, 0.0  ;;  %v514_v21 = vpop.f32.mrb[13].mxu1  ;;  %v999_v22 = vpop.f32.mrb[14].mxu0 }
 0x100   : > { %794 = vst.msk [vmem:[%s1158_s30 + $0x68] sm:$0xf] %vm767_vm2, %v959_v4  ;;  %776 = vst.msk [vmem:[%s1158_s30 + $0x20] sm:$0xf] %vm767_vm2, %v941_v5  ;;  %v960_v15 = vpack.c.bf16 %v634_v6, %v634_v6  ;;  %v566_v17 = vmul.f32 %v1014_v13, %v1133_v18  ;;  %v548_v19 = vmul.f32 %v1133_v18, %v450_v14  ;;  %v1015_v27 = vpop.f32.mrb[14].mxu1  ;;  %v453_v28 = vpop.f32.mrb[15].mxu0 }
 0x101   : > { %v942_v16 = vpack.c.bf16 %v616_v7, %v616_v7  ;;  %792 = vst.msk [vmem:[%s1158_s30 + $0x60] sm:$0xf] %vm767_vm2, %v957_v9  ;;  %779 = vst.msk [vmem:[%s1158_s30 + $0x2c] sm:$0xf] %vm767_vm2, %v944_v10  ;;  %v958_v23 = vpack.c.bf16 %v632_v11, %v632_v11  ;;  %v589_v24 = vadd.f32 %v1138_v20, %v550_v12  ;;  %v517_v33 = vpop.f32.mrb[15].mxu1 }
 0x102   : > { %v564_v25 = vmul.f32 %v1133_v18, %v514_v21  ;;  %v551_v26 = vmul.f32 %v999_v22, %v1133_v18  ;;  %795 = vst.msk [vmem:[%s1158_s30 + $0x6c] sm:$0xf] %vm767_vm2, %v960_v15  ;;  %v605_v29 = vadd.f32 %v1138_v20, %v566_v17  ;;  %v587_v30 = vadd.f32 %v1138_v20, %v548_v19 }
 0x103   : > { %777 = vst.msk [vmem:[%s1158_s30 + $0x24] sm:$0xf] %vm767_vm2, %v942_v16  ;;  %v567_v31 = vmul.f32 %v1015_v27, %v1133_v18  ;;  %v549_v32 = vmul.f32 %v1133_v18, %v453_v28  ;;  %793 = vst.msk [vmem:[%s1158_s30 + $0x64] sm:$0xf] %vm767_vm2, %v958_v23  ;;  %v621_v34 = vmax.f32 %v589_v24, 0.0  ;;  %v565_v37 = vmul.f32 %v1133_v18, %v517_v33 }
 0x104   : > { %v603_v35 = vadd.f32 %v1138_v20, %v564_v25  ;;  %v590_v36 = vadd.f32 %v1138_v20, %v551_v26  ;;  %v637_v38 = vmax.f32 %v605_v29, 0.0  ;;  %v619_v39 = vmax.f32 %v587_v30, 0.0 }
 0x105   : > { %v606_v40 = vadd.f32 %v1138_v20, %v567_v31  ;;  %v588_v41 = vadd.f32 %v1138_v20, %v549_v32  ;;  %v947_v42 = vpack.c.bf16 %v621_v34, %v621_v34  ;;  %v604_v45 = vadd.f32 %v1138_v20, %v565_v37 }
 0x106   : > { %v635_v43 = vmax.f32 %v603_v35, 0.0  ;;  %v622_v44 = vmax.f32 %v590_v36, 0.0  ;;  %v963_v46 = vpack.c.bf16 %v637_v38, %v637_v38  ;;  %v945_v47 = vpack.c.bf16 %v619_v39, %v619_v39 }
 0x107   : > { %v638_v18 = vmax.f32 %v606_v40, 0.0  ;;  %v620_v48 = vmax.f32 %v588_v41, 0.0  ;;  %782 = vst.msk [vmem:[%s1158_s30 + $0x38] sm:$0xf] %vm767_vm2, %v947_v42  ;;  %v636_v51 = vmax.f32 %v604_v45, 0.0 }
 0x108   : > { %v961_v49 = vpack.c.bf16 %v635_v43, %v635_v43  ;;  %v948_v50 = vpack.c.bf16 %v622_v44, %v622_v44  ;;  %798 = vst.msk [vmem:[%s1158_s30 + $0x78] sm:$0xf] %vm767_vm2, %v963_v46  ;;  %780 = vst.msk [vmem:[%s1158_s30 + $0x30] sm:$0xf] %vm767_vm2, %v945_v47 }
 0x109   : > { %v964_v52 = vpack.c.bf16 %v638_v18, %v638_v18  ;;  %v946_v53 = vpack.c.bf16 %v620_v48, %v620_v48  ;;  %v962_v20 = vpack.c.bf16 %v636_v51, %v636_v51 }
 0x10a   : > { %796 = vst.msk [vmem:[%s1158_s30 + $0x70] sm:$0xf] %vm767_vm2, %v961_v49  ;;  %783 = vst.msk [vmem:[%s1158_s30 + $0x3c] sm:$0xf] %vm767_vm2, %v948_v50 }
 0x10b   : > { %799 = vst.msk [vmem:[%s1158_s30 + $0x7c] sm:$0xf] %vm767_vm2, %v964_v52  ;;  %781 = vst.msk [vmem:[%s1158_s30 + $0x34] sm:$0xf] %vm767_vm2, %v946_v53 }
 0x10c   : > { %797 = vst.msk [vmem:[%s1158_s30 + $0x74] sm:$0xf] %vm767_vm2, %v962_v20 }
 0x10d PF: > { %s14_s15 = sadd.s32 1, %s1050_s15  }
 0x10e   : > { %p11_p4 = scmp.ge.s32.totalorder %s14_s15, 4  }
 0x110   :  { %13 = sbr.rel (!%p11_p4) target bundleno = 1 (0x1), region = 66 }

</bundles_post_ra>
